<compile_context>
chip_gen: v5e
topology: v5e:2x2
jax: 0.10.0
libtpu: 0.0.40
codegen_flags: <defaults>
</compile_context>

<pallas_src>
import functools

import numpy as np
import jax
import jax.numpy as jnp
from jax.experimental import pallas as pl
from jax.experimental.pallas import tpu as pltpu


# --------------------------------------------------------------------------- #
# helpers
# --------------------------------------------------------------------------- #
def _round_up(v, m):
    return ((v + m - 1) // m) * m


def _vmem_capacity():
    """Physical VMEM per TensorCore for this generation (conservative default)."""
    try:
        return int(pltpu.get_tpu_info().vmem_capacity_bytes)
    except Exception:
        return 64 * 1024 * 1024          # v7x per-core VMEM (smallest of v5e/v6e/v7x)


def _vmem_limit_bytes(request_bytes):
    """Clamp a VMEM request to 75% of physical capacity, floor at 16 MiB."""
    cap = _vmem_capacity()
    return int(max(16 * 1024 * 1024, min(int(request_bytes), (cap * 3) // 4)))


def _masked_log_softmax(z, valid_cols):
    """log_softmax over axis 1; lanes >= valid_cols are ignored and written as 0."""
    col = jax.lax.broadcasted_iota(jnp.int32, z.shape, 1)
    valid = col < valid_cols
    zm = jnp.where(valid, z, -jnp.inf)
    m = jnp.max(zm, axis=1, keepdims=True)
    e = jnp.where(valid, jnp.exp(zm - m), 0.0)
    lse = jnp.log(jnp.sum(e, axis=1, keepdims=True))
    return jnp.where(valid, zm - m - lse, 0.0)


# --------------------------------------------------------------------------- #
# fused kernel (small / medium graphs: everything resident in VMEM, one call)
# --------------------------------------------------------------------------- #
def fused_gcn_kernel(a1_ref, x_ref, w1_ref, b1_ref, a2_ref, w2_ref, b2_ref,
                     o_ref, *, valid_classes):
    # Layer 1: the X @ W1 projection is computed exactly once.
    xw1 = jnp.dot(x_ref[...], w1_ref[...], preferred_element_type=jnp.float32)
    h = jnp.dot(a1_ref[...], xw1, preferred_element_type=jnp.float32) + b1_ref[...]
    h = jnp.maximum(h, 0.0)
    # F.dropout(x, training=self.training): module is in eval mode -> identity.
    # TODO(synk): stochastic dropout via pltpu.prng_random_bits for training mode.
    # Layer 2 + log_softmax (padded class lanes masked, written back as 0.0).
    hw2 = jnp.dot(h, w2_ref[...], preferred_element_type=jnp.float32)
    z = jnp.dot(a2_ref[...], hw2, preferred_element_type=jnp.float32) + b2_ref[...]
    o_ref[...] = _masked_log_softmax(z, valid_classes).astype(o_ref.dtype)


def gcn_forward_fused(x, a1, a2, w1, b1, w2, b2):
    n, f = x.shape
    hid, c = w1.shape[1], w2.shape[1]

    npad = _round_up(n, 8)            # f32 sublane multiple only — NOT 128
    fpad = _round_up(f, 128)          # lane-dense feature dims
    hpad = _round_up(hid, 128)
    cpad = _round_up(c, 128)

    xp = jnp.pad(x, ((0, npad - n), (0, fpad - f))).astype(jnp.float32)
    a1p = jnp.pad(a1, ((0, npad - n), (0, npad - n))).astype(jnp.float32)
    a2p = jnp.pad(a2, ((0, npad - n), (0, npad - n))).astype(jnp.float32)
    w1p = jnp.pad(w1, ((0, fpad - f), (0, hpad - hid))).astype(jnp.float32)
    b1p = jnp.pad(b1, ((0, 0), (0, hpad - hid))).astype(jnp.float32)
    w2p = jnp.pad(w2, ((0, hpad - hid), (0, cpad - c))).astype(jnp.float32)
    b2p = jnp.pad(b2, ((0, 0), (0, cpad - c))).astype(jnp.float32)

    flops = 2 * npad * (fpad * hpad + npad * hpad + hpad * cpad + npad * cpad)
    bytes_accessed = 4 * (2 * npad * npad + npad * fpad + fpad * hpad
                          + hpad * cpad + hpad + cpad + npad * cpad)

    out = pl.pallas_call(
        functools.partial(fused_gcn_kernel, valid_classes=c),
        out_shape=jax.ShapeDtypeStruct((npad, cpad), jnp.float32),
        cost_estimate=pl.CostEstimate(flops=int(flops),
                                      transcendentals=int(npad * cpad),
                                      bytes_accessed=int(bytes_accessed)),
    )(a1p, xp, w1p, b1p, a2p, w2p, b2p)
    return out[:n, :c]


# --------------------------------------------------------------------------- #
# tiled path (large graphs): generic  out = act(A @ B + bias)  matmul kernel
# --------------------------------------------------------------------------- #
def matmul_act_kernel(a_ref, b_ref, bias_ref, o_ref, acc_ref, *,
                      activation, valid_cols):
    k = pl.program_id(1)

    @pl.when(k == 0)
    def _init():
        acc_ref[...] = jnp.zeros_like(acc_ref)

    acc_ref[...] += jnp.dot(a_ref[...], b_ref[...],
                            preferred_element_type=jnp.float32)

    @pl.when(k == pl.num_programs(1) - 1)
    def _finalize():
        z = acc_ref[...] + bias_ref[...]
        if activation == "relu":
            z = jnp.maximum(z, 0.0)
        elif activation == "log_softmax":
            z = _masked_log_softmax(z, valid_cols)
        o_ref[...] = z.astype(o_ref.dtype)


def matmul_act(a, b, bias, *, activation=None, valid_cols=None,
               out_dtype=jnp.float32, tm=256, tk=256):
    """out = act(a @ b + bias). a:(M,K), b:(K,N), bias:(1,N); M % tm == 0,
    K and N multiples of 128.  Grid = (row tiles, K tiles), f32 accumulator."""
    m, kdim = a.shape
    _, nn = b.shape
    tm = min(tm, m)
    tk = tk if kdim % tk == 0 else 128
    grid = (m // tm, kdim // tk)

    out_isz = np.dtype(out_dtype).itemsize
    # Double-buffered input/output tiles + the f32 accumulator, with headroom
    # for Mosaic internal scratch; clamped to 75% of this generation's VMEM.
    footprint = (2 * (tm * tk * a.dtype.itemsize
                      + tk * nn * b.dtype.itemsize
                      + nn * 4
                      + tm * nn * out_isz)
                 + tm * nn * 4)
    vmem_limit = _vmem_limit_bytes(4 * footprint)

    kernel = functools.partial(matmul_act_kernel, activation=activation,
                               valid_cols=valid_cols)
    return pl.pallas_call(
        kernel,
        out_shape=jax.ShapeDtypeStruct((m, nn), out_dtype),
        grid_spec=pltpu.PrefetchScalarGridSpec(
            num_scalar_prefetch=0,
            grid=grid,
            in_specs=[
                pl.BlockSpec((tm, tk), lambda i, k: (i, k)),    # A row/K tile
                pl.BlockSpec((tk, nn), lambda i, k: (k, 0)),    # B K tile (full width)
                pl.BlockSpec((1, nn), lambda i, k: (0, 0)),     # bias (tiny, invariant)
            ],
            out_specs=pl.BlockSpec((tm, nn), lambda i, k: (i, 0)),
            scratch_shapes=[pltpu.VMEM((tm, nn), jnp.float32)],
        ),
        compiler_params=pltpu.CompilerParams(
            dimension_semantics=("parallel", "arbitrary"),
            vmem_limit_bytes=vmem_limit,
        ),
        cost_estimate=pl.CostEstimate(
            flops=int(2 * m * kdim * nn),
            transcendentals=int(m * nn) if activation == "log_softmax" else 0,
            bytes_accessed=int(a.size * a.dtype.itemsize
                               + b.size * b.dtype.itemsize
                               + nn * 4 + m * nn * out_isz)),
    )(a, b, bias)


def gcn_forward_tiled(x, a1, a2, w1, b1, w2, b2, *, tm=256, tk=256):
    n, f = x.shape
    hid, c = w1.shape[1], w2.shape[1]

    npad = _round_up(n, tm)
    fpad = _round_up(f, 128)
    hpad = _round_up(hid, 128)
    cpad = _round_up(c, 128)

    # bf16 MXU operands; f32 accumulation / bias / epilogues.
    xp = jnp.pad(x, ((0, npad - n), (0, fpad - f))).astype(jnp.bfloat16)
    a1p = jnp.pad(a1, ((0, npad - n), (0, npad - n))).astype(jnp.bfloat16)
    a2p = jnp.pad(a2, ((0, npad - n), (0, npad - n))).astype(jnp.bfloat16)
    w1p = jnp.pad(w1, ((0, fpad - f), (0, hpad - hid))).astype(jnp.bfloat16)
    b1p = jnp.pad(b1, ((0, 0), (0, hpad - hid))).astype(jnp.float32)
    w2p = jnp.pad(w2, ((0, hpad - hid), (0, cpad - c))).astype(jnp.bfloat16)
    b2p = jnp.pad(b2, ((0, 0), (0, cpad - c))).astype(jnp.float32)

    zeros_h = jnp.zeros((1, hpad), jnp.float32)
    zeros_c = jnp.zeros((1, cpad), jnp.float32)

    # Layer 1: XW1 precomputed once (rounded to bf16 once), then A1 @ XW1 + relu.
    xw1 = matmul_act(xp, w1p, zeros_h, out_dtype=jnp.bfloat16, tm=tm, tk=tk)
    h = matmul_act(a1p, xw1, b1p, activation="relu",
                   out_dtype=jnp.bfloat16, tm=tm, tk=tk)
    # F.dropout in eval mode -> identity.
    # Layer 2: HW2 precomputed, then A2 @ HW2 + bias + log_softmax.
    hw2 = matmul_act(h, w2p, zeros_c, out_dtype=jnp.bfloat16, tm=tm, tk=tk)
    z = matmul_act(a2p, hw2, b2p, activation="log_softmax", valid_cols=c,
                   out_dtype=jnp.float32, tm=tm, tk=tk)
    return z[:n, :c]


def my_gcn_forward(x, a1, a2, w1, b1, w2, b2):
    """Static dispatch: fully fused single pallas_call when the padded problem
    fits comfortably in VMEM, otherwise the tiled multi-call path."""
    n, f = x.shape
    hid, c = w1.shape[1], w2.shape[1]
    npad = _round_up(n, 8)
    fpad, hpad, cpad = (_round_up(v, 128) for v in (f, hid, c))
    elems = (2 * npad * npad + npad * fpad + fpad * hpad + hpad * cpad
             + hpad + cpad + 2 * npad * hpad + 2 * npad * cpad)
    if 2 * 4 * elems <= _vmem_capacity() // 2:
        return gcn_forward_fused(x, a1, a2, w1, b1, w2, b2)
    return gcn_forward_tiled(x, a1, a2, w1, b1, w2, b2)


# --------------------------------------------------------------------------- #
# JAX glue (graph construction, parameters, reference)
# --------------------------------------------------------------------------- #
def build_norm_adj(edge_index, edge_weight, num_nodes):
    """Dense  D^-1/2 (A + I) D^-1/2  with PyG GCNConv conventions (f32)."""
    src, dst = edge_index[0], edge_index[1]
    if edge_weight is None:
        edge_weight = jnp.ones(src.shape[0], dtype=jnp.float32)
    adj = jnp.zeros((num_nodes, num_nodes), dtype=jnp.float32)
    adj = adj.at[dst, src].add(edge_weight)
    adj = adj + jnp.eye(num_nodes, dtype=jnp.float32)
    deg = jnp.sum(adj, axis=1)
    d_inv_sqrt = jnp.where(deg > 0, 1.0 / jnp.sqrt(deg), 0.0)
    return d_inv_sqrt[:, None] * adj * d_inv_sqrt[None, :]


def glorot(key, shape):
    fan_in, fan_out = shape
    limit = jnp.sqrt(6.0 / (fan_in + fan_out))
    return jax.random.uniform(key, shape, jnp.float32, -limit, limit)


def make_problem(key, num_nodes, num_features, hidden, num_classes):
    k_x, k_w1, k_w2, k_e, k_ew = jax.random.split(key, 5)
    x = jax.random.normal(k_x, (num_nodes, num_features), dtype=jnp.float32)
    ring_src = jnp.arange(num_nodes, dtype=jnp.int32)
    ring_dst = (ring_src + 1) % num_nodes
    rand_src = jax.random.randint(k_e, (num_nodes,), 0, num_nodes, dtype=jnp.int32)
    rand_dst = (rand_src + 3) % num_nodes
    src = jnp.concatenate([ring_src, ring_dst, rand_src])
    dst = jnp.concatenate([ring_dst, ring_src, rand_dst])
    edge_index = jnp.stack([src, dst])
    edge_weight = jax.random.uniform(k_ew, (src.shape[0],), jnp.float32, 0.5, 1.5)
    w1 = glorot(k_w1, (num_features, hidden))
    b1 = jnp.zeros((1, hidden), jnp.float32)
    w2 = glorot(k_w2, (hidden, num_classes))
    b2 = jnp.zeros((1, num_classes), jnp.float32)
    a1 = build_norm_adj(edge_index, edge_weight, num_nodes)  # conv1 uses edge_weight
    a2 = build_norm_adj(edge_index, None, num_nodes)         # conv2 has no edge_weight
    return x, a1, a2, w1, b1, w2, b2


def reference(x, a1, a2, w1, b1, w2, b2):
    mm = lambda p, q: jnp.matmul(p, q, precision="highest")
    h = jnp.maximum(mm(a1, mm(x, w1)) + b1, 0.0)
    z = mm(a2, mm(h, w2)) + b2
    return jax.nn.log_softmax(z, axis=1)


if __name__ == "__main__":
    key = jax.random.PRNGKey(0)
    k_small, k_big = jax.random.split(key)

    # --- shipped size: 16 nodes, 16 features, 64 hidden, 8 classes (fused) --- #
    args_small = make_problem(k_small, 16, 16, 64, 8)
    out_small = jax.block_until_ready(jax.jit(my_gcn_forward)(*args_small))
    assert out_small.shape == (16, 8)
    assert jnp.allclose(jnp.sum(jnp.exp(out_small), axis=1), 1.0, atol=1e-3)
    assert jnp.max(jnp.abs(out_small - reference(*args_small))) < 0.1

    # --- larger graph to exercise the tiled (bf16, 256-tile) path ----------- #
    args_big = make_problem(k_big, 300, 16, 64, 8)
    out_big = jax.block_until_ready(jax.jit(gcn_forward_tiled)(*args_big))
    assert out_big.shape == (300, 8)
    assert jnp.allclose(jnp.sum(jnp.exp(out_big), axis=1), 1.0, atol=1e-2)
    assert jnp.max(jnp.abs(out_big - reference(*args_big))) < 0.25

    print("KERNEL_OK")
</pallas_src>

<mosaic_0001>
module attributes {stable_mosaic.version = 11 : i64} {
  func.func @fused_gcn_kernel(%arg0: memref<16x16xf32, #tpu.memory_space<vmem>>, %arg1: memref<16x128xf32, #tpu.memory_space<vmem>>, %arg2: memref<128x128xf32, #tpu.memory_space<vmem>>, %arg3: memref<1x128xf32, #tpu.memory_space<vmem>>, %arg4: memref<16x16xf32, #tpu.memory_space<vmem>>, %arg5: memref<128x128xf32, #tpu.memory_space<vmem>>, %arg6: memref<1x128xf32, #tpu.memory_space<vmem>>, %arg7: memref<16x128xf32, #tpu.memory_space<vmem>>) attributes {dimension_semantics = [], scalar_prefetch = 0 : i64, scratch_operands = 0 : i64, tpu.core_type = #tpu.core_type<tc>} {
    %c0 = arith.constant 0 : index
    %c0_0 = arith.constant 0 : index
    %0 = vector.load %arg1[%c0, %c0_0] : memref<16x128xf32, #tpu.memory_space<vmem>>, vector<16x128xf32>
    %c0_1 = arith.constant 0 : index
    %c0_2 = arith.constant 0 : index
    %1 = vector.load %arg2[%c0_1, %c0_2] : memref<128x128xf32, #tpu.memory_space<vmem>>, vector<128x128xf32>
    %cst = arith.constant dense<0.000000e+00> : vector<16x128xf32>
    %2 = tpu.matmul %0, %1, %cst {dimension_numbers = #tpu.dot_dimension_numbers<[1], [0], [0], [1], [0, 0, 1, 1], [], []>} : vector<16x128xf32>, vector<128x128xf32>, vector<16x128xf32> -> vector<16x128xf32>
    %c0_3 = arith.constant 0 : index
    %c0_4 = arith.constant 0 : index
    %3 = vector.load %arg0[%c0_3, %c0_4] : memref<16x16xf32, #tpu.memory_space<vmem>>, vector<16x16xf32>
    %cst_5 = arith.constant dense<0.000000e+00> : vector<16x128xf32>
    %4 = tpu.matmul %3, %2, %cst_5 {dimension_numbers = #tpu.dot_dimension_numbers<[1], [0], [0], [1], [0, 0, 1, 1], [], []>} : vector<16x16xf32>, vector<16x128xf32>, vector<16x128xf32> -> vector<16x128xf32>
    %c0_6 = arith.constant 0 : index
    %c0_7 = arith.constant 0 : index
    %5 = vector.load %arg3[%c0_6, %c0_7] : memref<1x128xf32, #tpu.memory_space<vmem>>, vector<1x128xf32>
    %6 = vector.broadcast %5 : vector<1x128xf32> to vector<16x128xf32>
    %7 = arith.addf %4, %6 : vector<16x128xf32>
    %cst_8 = arith.constant 0.000000e+00 : f32
    %8 = vector.broadcast %cst_8 : f32 to vector<16x128xf32>
    %9 = arith.maximumf %7, %8 : vector<16x128xf32>
    %c0_9 = arith.constant 0 : index
    %c0_10 = arith.constant 0 : index
    %10 = vector.load %arg5[%c0_9, %c0_10] : memref<128x128xf32, #tpu.memory_space<vmem>>, vector<128x128xf32>
    %cst_11 = arith.constant dense<0.000000e+00> : vector<16x128xf32>
    %11 = tpu.matmul %9, %10, %cst_11 {dimension_numbers = #tpu.dot_dimension_numbers<[1], [0], [0], [1], [0, 0, 1, 1], [], []>} : vector<16x128xf32>, vector<128x128xf32>, vector<16x128xf32> -> vector<16x128xf32>
    %c0_12 = arith.constant 0 : index
    %c0_13 = arith.constant 0 : index
    %12 = vector.load %arg4[%c0_12, %c0_13] : memref<16x16xf32, #tpu.memory_space<vmem>>, vector<16x16xf32>
    %cst_14 = arith.constant dense<0.000000e+00> : vector<16x128xf32>
    %13 = tpu.matmul %12, %11, %cst_14 {dimension_numbers = #tpu.dot_dimension_numbers<[1], [0], [0], [1], [0, 0, 1, 1], [], []>} : vector<16x16xf32>, vector<16x128xf32>, vector<16x128xf32> -> vector<16x128xf32>
    %c0_15 = arith.constant 0 : index
    %c0_16 = arith.constant 0 : index
    %14 = vector.load %arg6[%c0_15, %c0_16] : memref<1x128xf32, #tpu.memory_space<vmem>>, vector<1x128xf32>
    %15 = vector.broadcast %14 : vector<1x128xf32> to vector<16x128xf32>
    %16 = arith.addf %13, %15 : vector<16x128xf32>
    %17 = tpu.iota {dimensions = array<i32: 1>} : vector<16x128xi32>
    %c8_i32 = arith.constant 8 : i32
    %18 = vector.broadcast %c8_i32 : i32 to vector<16x128xi32>
    %19 = arith.cmpi slt, %17, %18 : vector<16x128xi32>
    %cst_17 = arith.constant 0xFF800000 : f32
    %20 = vector.broadcast %cst_17 : f32 to vector<16x128xf32>
    %21 = arith.select %19, %16, %20 : vector<16x128xi1>, vector<16x128xf32>
    %cst_18 = arith.constant dense<0xFF800000> : vector<16xf32>
    %22 = vector.multi_reduction <maximumf>, %21, %cst_18 [1] : vector<16x128xf32> to vector<16xf32>
    %23 = vector.shape_cast %22 : vector<16xf32> to vector<16x1xf32>
    %24 = vector.broadcast %23 : vector<16x1xf32> to vector<16x128xf32>
    %25 = arith.subf %21, %24 : vector<16x128xf32>
    %26 = math.exp %25 : vector<16x128xf32>
    %cst_19 = arith.constant 0.000000e+00 : f32
    %27 = vector.broadcast %cst_19 : f32 to vector<16x128xf32>
    %28 = arith.select %19, %26, %27 : vector<16x128xi1>, vector<16x128xf32>
    %cst_20 = arith.constant dense<0.000000e+00> : vector<16xf32>
    %29 = vector.multi_reduction <add>, %28, %cst_20 [1] : vector<16x128xf32> to vector<16xf32>
    %30 = vector.shape_cast %29 : vector<16xf32> to vector<16x1xf32>
    %31 = math.log %30 : vector<16x1xf32>
    %32 = vector.broadcast %23 : vector<16x1xf32> to vector<16x128xf32>
    %33 = arith.subf %21, %32 : vector<16x128xf32>
    %34 = vector.broadcast %31 : vector<16x1xf32> to vector<16x128xf32>
    %35 = arith.subf %33, %34 : vector<16x128xf32>
    %cst_21 = arith.constant 0.000000e+00 : f32
    %36 = vector.broadcast %cst_21 : f32 to vector<16x128xf32>
    %37 = arith.select %19, %35, %36 : vector<16x128xi1>, vector<16x128xf32>
    %c0_22 = arith.constant 0 : index
    %c0_23 = arith.constant 0 : index
    %38 = vector.load %arg7[%c0_22, %c0_23] : memref<16x128xf32, #tpu.memory_space<vmem>>, vector<16x128xf32>
    tpu.vector_store %arg7[%c0_22, %c0_23], %37 {strides = array<i32>} : memref<16x128xf32, #tpu.memory_space<vmem>>, vector<16x128xf32>,
    return
  }
}

</mosaic_0001>

<bundles_post_ra>
// kernel: my_gcn_forward.1
= control target key start
LH: loop header
LB: loop body
LE: loop exit
PB: predicated region body
PF: predicated region fallthrough
CT: control target
= control target key end

     0   :  { %vm73_vm0 = vcmask 130048   ;;  %v179_v49 = vlaneseq  ;;  %s404_s2 = inlined_call_operand.vmem [shape: f32[128,128], index: 2, kind: input, shape index: {}]   ;;  %s405_s1 = inlined_call_operand.vmem [shape: f32[16,128], index: 1, kind: input, shape index: {}]   ;;  %s406_s3 = inlined_call_operand.vmem [shape: f32[1,128], index: 3, kind: input, shape index: {}]   ;;  %s407_s5 = inlined_call_operand.vmem [shape: f32[128,128], index: 5, kind: input, shape index: {}]   ;;  %s408_s0 = inlined_call_operand.vmem [shape: f32[16,16], index: 0, kind: input, shape index: {}]   ;;  %s409_s6 = inlined_call_operand.vmem [shape: f32[1,128], index: 6, kind: input, shape index: {}]   ;;  %s410_s4 = inlined_call_operand.vmem [shape: f32[16,16], index: 4, kind: input, shape index: {}]   ;;  %s411_s7 = inlined_call_operand.vmem [shape: f32[16,128], index: 7, kind: output, shape index: {}]  }
   0x1   :  { %v43_v0 = vld [vmem:[%s404_s2 + $0x78] sm:$0xff]  ;;  %v42_v1 = vld [vmem:[%s404_s2 + $0x70] sm:$0xff]  ;;  %v41_v2 = vld [vmem:[%s404_s2 + $0x68] sm:$0xff] }
   0x2   :  { %44 = vmatpush.msra.mxu0 %v43_v0  ;;  %v40_v3 = vld [vmem:[%s404_s2 + $0x60] sm:$0xff]  ;;  %v39_v4 = vld [vmem:[%s404_s2 + $0x58] sm:$0xff]  ;;  %v38_v5 = vld [vmem:[%s404_s2 + $0x50] sm:$0xff]  ;;  %v180_v50 = vand.u32 127, %v179_v49 }
   0x3   :  { %v37_v6 = vld [vmem:[%s404_s2 + $0x48] sm:$0xff]  ;;  %v36_v7 = vld [vmem:[%s404_s2 + $0x40] sm:$0xff]  ;;  %v35_v8 = vld [vmem:[%s404_s2 + $0x38] sm:$0xff] }
   0x4   :  { %45 = vmatpush.msra.mxu0 %v42_v1  ;;  %v34_v9 = vld [vmem:[%s404_s2 + $0x30] sm:$0xff]  ;;  %v33_v10 = vld [vmem:[%s404_s2 + $0x28] sm:$0xff]  ;;  %v32_v11 = vld [vmem:[%s404_s2 + $0x20] sm:$0xff]  ;;  %vm181_vm1 = vcmp.lt.s32.totalorder %v180_v50, 8 }
   0x5   :  { %v31_v12 = vld [vmem:[%s404_s2 + $0x18] sm:$0xff]  ;;  %v30_v13 = vld [vmem:[%s404_s2 + $0x10] sm:$0xff]  ;;  %v29_v14 = vld [vmem:[%s404_s2 + $0x8] sm:$0xff] }
   0x6   :  { %46 = vmatpush.msra.mxu0 %v41_v2  ;;  %v28_v15 = vld [vmem:[%s404_s2] sm:$0xff]  ;;  %v27_v17 = vld [vmem:[%s405_s1 + $0x8] sm:$0xff]  ;;  %v120_v18 = vld [vmem:[%s407_s5 + $0x78] sm:$0xff] }
   0x7   :  { %v26_v16 = vld [vmem:[%s405_s1] sm:$0xff]  ;;  %v119_v19 = vld [vmem:[%s407_s5 + $0x70] sm:$0xff]  ;;  %121 = vmatpush.msra.mxu2 %v120_v18  ;;  %v118_v20 = vld [vmem:[%s407_s5 + $0x68] sm:$0xff] }
   0x8   :  { %47 = vmatpush.msra.mxu0 %v40_v3  ;;  %v117_v21 = vld [vmem:[%s407_s5 + $0x60] sm:$0xff]  ;;  %v116_v22 = vld [vmem:[%s407_s5 + $0x58] sm:$0xff]  ;;  %v115_v23 = vld [vmem:[%s407_s5 + $0x50] sm:$0xff] }
   0x9   :  { %122 = vmatpush.msra.mxu2 %v119_v19  ;;  %v114_v24 = vld [vmem:[%s407_s5 + $0x48] sm:$0xff]  ;;  %v113_v26 = vld [vmem:[%s407_s5 + $0x40] sm:$0xff]  ;;  %v112_v27 = vld [vmem:[%s407_s5 + $0x38] sm:$0xff] }
   0xa   :  { %48 = vmatpush.msra.mxu0 %v39_v4  ;;  %v111_v28 = vld [vmem:[%s407_s5 + $0x30] sm:$0xff]  ;;  %v110_v29 = vld [vmem:[%s407_s5 + $0x28] sm:$0xff]  ;;  %v109_v31 = vld [vmem:[%s407_s5 + $0x20] sm:$0xff] }
   0xb   :  { %123 = vmatpush.msra.mxu2 %v118_v20  ;;  %v67_v32 = vld [vmem:[%s408_s0] sm:$0xff]  ;;  %v108_v33 = vld [vmem:[%s407_s5 + $0x18] sm:$0xff]  ;;  %v68_v34 = vld [vmem:[%s408_s0 + $0x8] sm:$0xff] }
   0xc   :  { %49 = vmatpush.msra.mxu0 %v38_v5  ;;  %v107_v35 = vld [vmem:[%s407_s5 + $0x10] sm:$0xff]  ;;  %v106_v36 = vld [vmem:[%s407_s5 + $0x8] sm:$0xff]  ;;  %v105_v37 = vld [vmem:[%s407_s5] sm:$0xff] }
   0xd   :  { %124 = vmatpush.msra.mxu2 %v117_v21  ;;  %v218_v38 = vld [vmem:[%s406_s3] ss:$0 sm:$0xff]  ;;  %v145_v48 = vld [vmem:[%s410_s4 + $0x8] sm:$0xff] }
   0xe   :  { %50 = vmatpush.msra.mxu0 %v37_v6  ;;  %v144_v47 = vld [vmem:[%s410_s4] sm:$0xff] }
   0xf   :  { %125 = vmatpush.msra.mxu2 %v116_v22  ;;  %v219_v51 = vld [vmem:[%s409_s6] ss:$0 sm:$0xff] }
  0x10   :  { %51 = vmatpush.msra.mxu0 %v36_v7 }
  0x11   :  { %126 = vmatpush.msra.mxu2 %v115_v23 }
  0x12   :  { %52 = vmatpush.msra.mxu0 %v35_v8 }
  0x13   :  { %127 = vmatpush.msra.mxu2 %v114_v24 }
  0x14   :  { %53 = vmatpush.msra.mxu0 %v34_v9 }
  0x15   :  { %128 = vmatpush.msra.mxu2 %v113_v26 }
  0x16   :  { %54 = vmatpush.msra.mxu0 %v33_v10 }
  0x17   :  { %129 = vmatpush.msra.mxu2 %v112_v27 }
  0x18   :  { %55 = vmatpush.msra.mxu0 %v32_v11 }
  0x19   :  { %130 = vmatpush.msra.mxu2 %v111_v28 }
  0x1a   :  { %56 = vmatpush.msra.mxu0 %v31_v12 }
  0x1b   :  { %131 = vmatpush.msra.mxu2 %v110_v29 }
  0x1c   :  { %57 = vmatpush.msra.mxu0 %v30_v13 }
  0x1d   :  { %132 = vmatpush.msra.mxu2 %v109_v31 }
  0x1e   :  { %58 = vmatpush.msra.mxu0 %v29_v14 }
  0x1f   :  { %133 = vmatpush.msra.mxu2 %v108_v33 }
  0x20   :  { %59 = vmatpush.msra.mxu0 %v28_v15 }
  0x21   :  { %60 = vmatmul.f32.vlgmr.msra.gmra.mxu0 %v26_v16  ;;  %134 = vmatpush.msra.mxu2 %v107_v35 }
  0x23   :  { %135 = vmatpush.msra.mxu2 %v106_v36 }
  0x25   :  { %136 = vmatpush.msra.mxu2 %v105_v37 }
  0x29   :  { %63 = vmatmul.f32.gmra.mxu0 %v27_v17 }
  0x9e   :  { %v61_v25 = vpop.f32.mrf.mxu0 }
  0xa6   :  { %v64_v30 = vpop.f32.mrf.mxu0 }
  0xa7   :  { %94 = vmatpush.msra.mxu1 %v64_v30 }
  0xa9   :  { %95 = vmatpush.msra.mxu1 %v61_v25 }
  0xaa   :  { %214 = vmatmul.msk.f32.vlgmr.msra.gmra.mxu1 %vm73_vm0, %v67_v32 }
  0xb2   :  { %215 = vmatmul.msk.f32.gmra.mxu1 %vm73_vm0, %v68_v34 }
 0x127   :  { %v97_v39 = vpop.f32.mrf.mxu1 }
 0x128   :  { %v98_v40 = vadd.f32 %v218_v38, %v97_v39 }
 0x12a   :  { %v103_v41 = vmax.f32 %v98_v40, 0.0 }
 0x12c   :  { %137 = vmatmul.f32.vlgmr.msra.gmra.mxu2 %v103_v41 }
 0x12f   :  { %v100_v42 = vpop.f32.mrf.mxu1 }
 0x130   :  { %v101_v43 = vadd.f32 %v218_v38, %v100_v42 }
 0x132   :  { %v104_v44 = vmax.f32 %v101_v43, 0.0 }
 0x134   :  { %140 = vmatmul.f32.gmra.mxu2 %v104_v44 }
 0x1af   :  { %v138_v45 = vpop.f32.mrf.mxu2 }
 0x1b7   :  { %v141_v46 = vpop.f32.mrf.mxu2 }
 0x1b8   :  { %170 = vmatpush.msra.mxu3 %v141_v46 }
 0x1ba   :  { %171 = vmatpush.msra.mxu3 %v138_v45 }
 0x1bb   :  { %216 = vmatmul.msk.f32.vlgmr.msra.gmra.mxu3 %vm73_vm0, %v144_v47 }
 0x1c3   :  { %217 = vmatmul.msk.f32.gmra.mxu3 %vm73_vm0, %v145_v48 }
 0x23e   :  { %v173_v52 = vpop.f32.mrf.mxu3 }
 0x23f   :  { %v174_v53 = vadd.f32 %v219_v51, %v173_v52 }
 0x241   :  { %v182_v54 = vsel %vm181_vm1, %v174_v53, -inf }
 0x242   :  { %184 = vmax.xlane.f32.xlu0 %v182_v54 }
 0x246   :  { %v176_v55 = vpop.f32.mrf.mxu3 }
 0x247   :  { %v177_v56 = vadd.f32 %v219_v51, %v176_v55 }
 0x249   :  { %v183_v57 = vsel %vm181_vm1, %v177_v56, -inf }
 0x24a   :  { %186 = vmax.xlane.f32.xlu0 %v183_v57 }
 0x2b5   :  { %v185_v58 = vpop.xlane.xlu0 %184 }
 0x2b6   :  { %v188_v59 = vsub.f32 %v182_v54, %v185_v58 }
 0x2b8   :  { %v190_v60 = vmul.f32 1.442695, %v188_v59 }
 0x2ba   :  { %220 = vpow2.f32 %v190_v60 }
 0x2bd   :  { %v187_v61 = vpop.xlane.xlu0 %186 }
 0x2be   :  { %v189_v62 = vsub.f32 %v183_v57, %v187_v61 }
 0x2c0   :  { %v221_v63 = vpop.eup %220  ;;  %v192_v0 = vmul.f32 1.442695, %v189_v62 }
 0x2c1   :  { %v194_v1 = vsel %vm181_vm1, %v221_v63, 0.0 }
 0x2c2   :  { %222 = vpow2.f32 %v192_v0  ;;  %196 = vadd.xlane.f32.xlu1 %v194_v1 }
 0x2c8   :  { %v223_v2 = vpop.eup %222 }
 0x2c9   :  { %v195_v3 = vsel %vm181_vm1, %v223_v2, 0.0 }
 0x2ca   :  { %198 = vadd.xlane.f32.xlu1 %v195_v3 }
 0x335   :  { %v197_v4 = vpop.xlane.xlu1 %196 }
 0x336   :  { %224 = vlog2.f32 %v197_v4 }
 0x33c   :  { %v225_v5 = vpop.eup %224 }
 0x33d   :  { %v201_v6 = vmul.f32 0.6931472, %v225_v5  ;;  %v199_v7 = vpop.xlane.xlu1 %198 }
 0x33e   :  { %226 = vlog2.f32 %v199_v7 }
 0x33f   :  { %v204_v8 = vsub.f32 %v188_v59, %v201_v6 }
 0x341   :  { %v206_v9 = vsel %vm181_vm1, %v204_v8, 0.0 }
 0x342   :  { %208 = vst [vmem:[%s411_s7] sm:$0xff] %v206_v9 }
 0x344   :  { %v227_v10 = vpop.eup %226 }
 0x345   :  { %v203_v11 = vmul.f32 0.6931472, %v227_v10 }
 0x347   :  { %v205_v12 = vsub.f32 %v189_v62, %v203_v11 }
 0x349   :  { %v207_v13 = vsel %vm181_vm1, %v205_v12, 0.0 }
 0x34a   :  { %209 = vst [vmem:[%s411_s7 + $0x8] sm:$0xff] %v207_v13 }

</bundles_post_ra>
